<compile_context>
chip_gen: v7x
topology: tpu7x:2x2x1
jax: 0.10.0
libtpu: 0.0.40
codegen_flags: <defaults>
</compile_context>

<pallas_src>
import jax
import jax.numpy as jnp
from jax import lax
from jax.experimental import pallas as pl
from jax.experimental.pallas import tpu as pltpu


def _gru_recurrence_kernel(gi_ref, h0_ref, whh_ref, bhn_ref, hn_ref):
    """Whole GRU time recurrence in a single kernel invocation.

    gi_ref : (T, 3, B, H) f32 -- precomputed x_t @ W_ih^T + b_ih (r/z hidden
             biases already folded in); gate index is a leading axis.
    h0_ref : (B, H) f32 initial hidden state.
    whh_ref: (3, H, H) f32 -- whh_ref[g] = W_hh_g^T (gate order r, z, n).
    bhn_ref: (1, H) f32 -- hidden bias of the n gate.
    hn_ref : (B, H) f32 out -- final hidden state.
    """
    T = gi_ref.shape[0]
    B, H = h0_ref.shape

    # Hoist loop-invariant weight/bias loads (and the broadcast) out of the
    # unrolled recurrence.
    whh_r = whh_ref[0]
    whh_z = whh_ref[1]
    whh_n = whh_ref[2]
    bhn = jnp.broadcast_to(bhn_ref[...], (B, H))

    def step(t, h):
        gi_t = gi_ref[t]  # (3, B, H); gate split on a non-lane axis
        gh_r = jnp.dot(h, whh_r, preferred_element_type=jnp.float32)
        gh_z = jnp.dot(h, whh_z, preferred_element_type=jnp.float32)
        gh_n = jnp.dot(h, whh_n, preferred_element_type=jnp.float32) + bhn
        r = jax.nn.sigmoid(gi_t[0] + gh_r)
        z = jax.nn.sigmoid(gi_t[1] + gh_z)
        n = jnp.tanh(gi_t[2] + r * gh_n)
        return (1.0 - z) * n + z * h

    # Short static trip count -> fully unrolled for LLO scheduler visibility.
    h_last = lax.fori_loop(0, T, step, h0_ref[...], unroll=True)
    hn_ref[...] = h_last.astype(hn_ref.dtype)


def _fc_kernel(h_ref, wfc_ref, bfc_ref, out_ref):
    """out[:, tile] = h @ W_fc^T[:, tile] + b_fc[tile] (lane-dense V tile)."""
    out_ref[...] = (
        jnp.dot(h_ref[...], wfc_ref[...], preferred_element_type=jnp.float32)
        + bfc_ref[...]
    ).astype(out_ref.dtype)


def decoder_forward(x_tokens, init_hidden_state, params):
    """x_tokens: (B, T) int32, init_hidden_state: (1, B, H). Returns (out, hn)."""
    emb = params["embedding"]          # (V, E)
    w_ih = params["w_ih"]              # (3H, E)  gate order [r|z|n]
    w_hh = params["w_hh"]              # (3H, H)
    b_ih = params["b_ih"]              # (3H,)
    b_hh = params["b_hh"]              # (3H,)
    w_fc = params["w_fc"]              # (V, H)
    b_fc = params["b_fc"]              # (V,)

    B, T = x_tokens.shape
    V, E = emb.shape
    H = w_hh.shape[1]

    # ---- Plain-XLA glue: embedding gather + hoisted input-side projection ----
    # TODO(synk): fuse the embedding gather via scalar-prefetch row gather once
    # T*B*E is large enough to matter.
    x_emb = jnp.take(emb, x_tokens, axis=0).astype(jnp.float32)       # (B, T, E)
    gi = (
        jnp.dot(x_emb.reshape(B * T, E), w_ih.T,
                preferred_element_type=jnp.float32)
        + b_ih
    )                                                                  # (B*T, 3H)
    gi = gi.reshape(B, T, 3, H)
    # Fold the hidden-side biases of the r and z gates into the pre-activations
    # (b_hn must stay inside r * (W_hn h + b_hn), so it is passed separately).
    b_hh3 = b_hh.reshape(3, H).astype(jnp.float32)
    gi = gi + jnp.stack([b_hh3[0], b_hh3[1], jnp.zeros((H,), jnp.float32)])
    gi = jnp.transpose(gi, (1, 2, 0, 3))                               # (T, 3, B, H)

    h0 = init_hidden_state[0].astype(jnp.float32)                      # (B, H)
    whh_stack = jnp.transpose(w_hh.reshape(3, H, H), (0, 2, 1))        # (3, H, H)
    bhn = b_hh3[2].reshape(1, H)

    # ---- Pallas kernel 1: time recurrence (single invocation, unrolled) ----
    hn2d = pl.pallas_call(
        _gru_recurrence_kernel,
        out_shape=jax.ShapeDtypeStruct((B, H), jnp.float32),
    )(gi, h0, whh_stack, bhn)

    # ---- Pallas kernel 2: final FC, lane-dense tiles over padded vocab ----
    tv = 512 if V >= 512 else 128
    V_pad = pl.cdiv(V, tv) * tv
    wfc_T = jnp.zeros((H, V_pad), jnp.float32).at[:, :V].set(w_fc.T)
    bfc_p = jnp.zeros((1, V_pad), jnp.float32).at[:, :V].set(b_fc)

    out_pad = pl.pallas_call(
        _fc_kernel,
        out_shape=jax.ShapeDtypeStruct((B, V_pad), jnp.float32),
        grid_spec=pltpu.PrefetchScalarGridSpec(
            num_scalar_prefetch=0,
            grid=(V_pad // tv,),
            in_specs=[
                pl.BlockSpec((B, H), lambda j: (0, 0)),     # final hidden state
                pl.BlockSpec((H, tv), lambda j: (0, j)),    # W_fc^T tile
                pl.BlockSpec((1, tv), lambda j: (0, j)),    # b_fc tile
            ],
            out_specs=pl.BlockSpec((B, tv), lambda j: (0, j)),
        ),
        compiler_params=pltpu.CompilerParams(
            dimension_semantics=("parallel",),   # independent vocab tiles
        ),
    )(hn2d, wfc_T, bfc_p)
    out = out_pad[:, :V]

    hn = hn2d[None, :, :]   # (1, B, H) to match PyTorch GRU hn shape
    return out, hn


def _decoder_reference(x_tokens, init_hidden_state, params):
    """Pure-JAX reference matching PyTorch GRU gate order [r|z|n]."""
    emb, w_ih, w_hh = params["embedding"], params["w_ih"], params["w_hh"]
    b_ih, b_hh = params["b_ih"], params["b_hh"]
    w_fc, b_fc = params["w_fc"], params["b_fc"]
    B, T = x_tokens.shape
    H = w_hh.shape[1]
    x_emb = jnp.take(emb, x_tokens, axis=0)
    h = init_hidden_state[0]
    for t in range(T):
        x_t = x_emb[:, t, :]
        gi = x_t @ w_ih.T + b_ih
        gh = h @ w_hh.T + b_hh
        i_r, i_z, i_n = gi[:, :H], gi[:, H:2 * H], gi[:, 2 * H:]
        h_r, h_z, h_n = gh[:, :H], gh[:, H:2 * H], gh[:, 2 * H:]
        r = jax.nn.sigmoid(i_r + h_r)
        z = jax.nn.sigmoid(i_z + h_z)
        n = jnp.tanh(i_n + r * h_n)
        h = (1.0 - z) * n + z * h
    out = h @ w_fc.T + b_fc
    return out, h[None, :, :]


def init_params(key, voca_size, emb_size, decoder_dim):
    ks = jax.random.split(key, 7)
    H = decoder_dim
    scale = 1.0 / jnp.sqrt(jnp.float32(H))
    return {
        "embedding": jax.random.normal(ks[0], (voca_size, emb_size), jnp.float32),
        "w_ih": jax.random.uniform(ks[1], (3 * H, emb_size), jnp.float32, -scale, scale),
        "w_hh": jax.random.uniform(ks[2], (3 * H, H), jnp.float32, -scale, scale),
        "b_ih": jax.random.uniform(ks[3], (3 * H,), jnp.float32, -scale, scale),
        "b_hh": jax.random.uniform(ks[4], (3 * H,), jnp.float32, -scale, scale),
        "w_fc": jax.random.uniform(ks[5], (voca_size, H), jnp.float32, -scale, scale),
        "b_fc": jax.random.uniform(ks[6], (voca_size,), jnp.float32, -scale, scale),
    }


if __name__ == "__main__":
    voca_size, emb_size, decoder_dim = 64, 32, 32
    B, T = 2, 8

    key = jax.random.PRNGKey(0)
    kp, kx, kh = jax.random.split(key, 3)

    params = init_params(kp, voca_size, emb_size, decoder_dim)
    x = jax.random.randint(kx, (B, T), 0, voca_size, dtype=jnp.int32)
    init_hidden_state = jax.random.normal(kh, (1, B, decoder_dim), jnp.float32)

    out, hn = jax.jit(decoder_forward)(x, init_hidden_state, params)
    jax.block_until_ready((out, hn))

    assert out.shape == (B, voca_size)
    assert hn.shape == (1, B, decoder_dim)

    out_ref, hn_ref = _decoder_reference(x, init_hidden_state, params)
    assert jnp.allclose(out, out_ref, atol=1e-4, rtol=1e-4)
    assert jnp.allclose(hn, hn_ref, atol=1e-4, rtol=1e-4)

    print("KERNEL_OK")
</pallas_src>

<mosaic_0001>
module attributes {stable_mosaic.version = 11 : i64} {
  func.func @_gru_recurrence_kernel(%arg0: memref<8x3x2x32xf32, #tpu.memory_space<vmem>>, %arg1: memref<2x32xf32, #tpu.memory_space<vmem>>, %arg2: memref<3x32x32xf32, #tpu.memory_space<vmem>>, %arg3: memref<1x32xf32, #tpu.memory_space<vmem>>, %arg4: memref<2x32xf32, #tpu.memory_space<vmem>>) attributes {dimension_semantics = [], scalar_prefetch = 0 : i64, scratch_operands = 0 : i64, tpu.core_type = #tpu.core_type<tc>} {
    %c0 = arith.constant 0 : index
    %c0_0 = arith.constant 0 : index
    %c0_1 = arith.constant 0 : index
    %0 = vector.load %arg2[%c0, %c0_0, %c0_1] : memref<3x32x32xf32, #tpu.memory_space<vmem>>, vector<1x32x32xf32>
    %1 = vector.shape_cast %0 : vector<1x32x32xf32> to vector<32x32xf32>
    %c1 = arith.constant 1 : index
    %c0_2 = arith.constant 0 : index
    %c0_3 = arith.constant 0 : index
    %2 = vector.load %arg2[%c1, %c0_2, %c0_3] : memref<3x32x32xf32, #tpu.memory_space<vmem>>, vector<1x32x32xf32>
    %3 = vector.shape_cast %2 : vector<1x32x32xf32> to vector<32x32xf32>
    %c2 = arith.constant 2 : index
    %c0_4 = arith.constant 0 : index
    %c0_5 = arith.constant 0 : index
    %4 = vector.load %arg2[%c2, %c0_4, %c0_5] : memref<3x32x32xf32, #tpu.memory_space<vmem>>, vector<1x32x32xf32>
    %5 = vector.shape_cast %4 : vector<1x32x32xf32> to vector<32x32xf32>
    %c0_6 = arith.constant 0 : index
    %c0_7 = arith.constant 0 : index
    %6 = vector.load %arg3[%c0_6, %c0_7] : memref<1x32xf32, #tpu.memory_space<vmem>>, vector<1x32xf32>
    %7 = vector.shape_cast %6 : vector<1x32xf32> to vector<1x32xf32>
    %8 = vector.broadcast %7 : vector<1x32xf32> to vector<2x32xf32>
    %c0_8 = arith.constant 0 : index
    %c0_9 = arith.constant 0 : index
    %9 = vector.load %arg1[%c0_8, %c0_9] : memref<2x32xf32, #tpu.memory_space<vmem>>, vector<2x32xf32>
    %c0_i32 = arith.constant 0 : i32
    %10 = arith.index_cast %c0_i32 : i32 to index
    %c0_10 = arith.constant 0 : index
    %c0_11 = arith.constant 0 : index
    %c0_12 = arith.constant 0 : index
    %11 = vector.load %arg0[%10, %c0_10, %c0_11, %c0_12] : memref<8x3x2x32xf32, #tpu.memory_space<vmem>>, vector<1x3x2x32xf32>
    %12 = vector.shape_cast %11 : vector<1x3x2x32xf32> to vector<3x2x32xf32>
    %cst = arith.constant dense<0.000000e+00> : vector<2x32xf32>
    %13 = tpu.matmul %9, %1, %cst {dimension_numbers = #tpu.dot_dimension_numbers<[1], [0], [0], [1], [0, 0, 1, 1], [], []>} : vector<2x32xf32>, vector<32x32xf32>, vector<2x32xf32> -> vector<2x32xf32>
    %cst_13 = arith.constant dense<0.000000e+00> : vector<2x32xf32>
    %14 = tpu.matmul %9, %3, %cst_13 {dimension_numbers = #tpu.dot_dimension_numbers<[1], [0], [0], [1], [0, 0, 1, 1], [], []>} : vector<2x32xf32>, vector<32x32xf32>, vector<2x32xf32> -> vector<2x32xf32>
    %cst_14 = arith.constant dense<0.000000e+00> : vector<2x32xf32>
    %15 = tpu.matmul %9, %5, %cst_14 {dimension_numbers = #tpu.dot_dimension_numbers<[1], [0], [0], [1], [0, 0, 1, 1], [], []>} : vector<2x32xf32>, vector<32x32xf32>, vector<2x32xf32> -> vector<2x32xf32>
    %16 = arith.addf %15, %8 : vector<2x32xf32>
    %17 = vector.extract_strided_slice %12 {offsets = [0, 0, 0], sizes = [1, 2, 32], strides = [1, 1, 1]} : vector<3x2x32xf32> to vector<1x2x32xf32>
    %18 = vector.shape_cast %17 : vector<1x2x32xf32> to vector<2x32xf32>
    %19 = arith.addf %18, %13 : vector<2x32xf32>
    %20 = arith.negf %19 : vector<2x32xf32>
    %21 = math.exp %20 : vector<2x32xf32>
    %cst_15 = arith.constant 1.000000e+00 : f32
    %22 = vector.broadcast %cst_15 : f32 to vector<2x32xf32>
    %23 = arith.addf %22, %21 : vector<2x32xf32>
    %24 = arith.divf %22, %23 : vector<2x32xf32>
    %25 = vector.extract_strided_slice %12 {offsets = [1, 0, 0], sizes = [1, 2, 32], strides = [1, 1, 1]} : vector<3x2x32xf32> to vector<1x2x32xf32>
    %26 = vector.shape_cast %25 : vector<1x2x32xf32> to vector<2x32xf32>
    %27 = arith.addf %26, %14 : vector<2x32xf32>
    %28 = arith.negf %27 : vector<2x32xf32>
    %29 = math.exp %28 : vector<2x32xf32>
    %cst_16 = arith.constant 1.000000e+00 : f32
    %30 = vector.broadcast %cst_16 : f32 to vector<2x32xf32>
    %31 = arith.addf %30, %29 : vector<2x32xf32>
    %32 = arith.divf %30, %31 : vector<2x32xf32>
    %33 = vector.extract_strided_slice %12 {offsets = [2, 0, 0], sizes = [1, 2, 32], strides = [1, 1, 1]} : vector<3x2x32xf32> to vector<1x2x32xf32>
    %34 = vector.shape_cast %33 : vector<1x2x32xf32> to vector<2x32xf32>
    %35 = arith.mulf %24, %16 : vector<2x32xf32>
    %36 = arith.addf %34, %35 : vector<2x32xf32>
    %37 = math.tanh %36 : vector<2x32xf32>
    %cst_17 = arith.constant 1.000000e+00 : f32
    %38 = vector.broadcast %cst_17 : f32 to vector<2x32xf32>
    %39 = arith.subf %38, %32 : vector<2x32xf32>
    %40 = arith.mulf %39, %37 : vector<2x32xf32>
    %41 = arith.mulf %32, %9 : vector<2x32xf32>
    %42 = arith.addf %40, %41 : vector<2x32xf32>
    %c1_i32 = arith.constant 1 : i32
    %43 = arith.index_cast %c1_i32 : i32 to index
    %c0_18 = arith.constant 0 : index
    %c0_19 = arith.constant 0 : index
    %c0_20 = arith.constant 0 : index
    %44 = vector.load %arg0[%43, %c0_18, %c0_19, %c0_20] : memref<8x3x2x32xf32, #tpu.memory_space<vmem>>, vector<1x3x2x32xf32>
    %45 = vector.shape_cast %44 : vector<1x3x2x32xf32> to vector<3x2x32xf32>
    %cst_21 = arith.constant dense<0.000000e+00> : vector<2x32xf32>
    %46 = tpu.matmul %42, %1, %cst_21 {dimension_numbers = #tpu.dot_dimension_numbers<[1], [0], [0], [1], [0, 0, 1, 1], [], []>} : vector<2x32xf32>, vector<32x32xf32>, vector<2x32xf32> -> vector<2x32xf32>
    %cst_22 = arith.constant dense<0.000000e+00> : vector<2x32xf32>
    %47 = tpu.matmul %42, %3, %cst_22 {dimension_numbers = #tpu.dot_dimension_numbers<[1], [0], [0], [1], [0, 0, 1, 1], [], []>} : vector<2x32xf32>, vector<32x32xf32>, vector<2x32xf32> -> vector<2x32xf32>
    %cst_23 = arith.constant dense<0.000000e+00> : vector<2x32xf32>
    %48 = tpu.matmul %42, %5, %cst_23 {dimension_numbers = #tpu.dot_dimension_numbers<[1], [0], [0], [1], [0, 0, 1, 1], [], []>} : vector<2x32xf32>, vector<32x32xf32>, vector<2x32xf32> -> vector<2x32xf32>
    %49 = arith.addf %48, %8 : vector<2x32xf32>
    %50 = vector.extract_strided_slice %45 {offsets = [0, 0, 0], sizes = [1, 2, 32], strides = [1, 1, 1]} : vector<3x2x32xf32> to vector<1x2x32xf32>
    %51 = vector.shape_cast %50 : vector<1x2x32xf32> to vector<2x32xf32>
    %52 = arith.addf %51, %46 : vector<2x32xf32>
    %53 = arith.negf %52 : vector<2x32xf32>
    %54 = math.exp %53 : vector<2x32xf32>
    %cst_24 = arith.constant 1.000000e+00 : f32
    %55 = vector.broadcast %cst_24 : f32 to vector<2x32xf32>
    %56 = arith.addf %55, %54 : vector<2x32xf32>
    %57 = arith.divf %55, %56 : vector<2x32xf32>
    %58 = vector.extract_strided_slice %45 {offsets = [1, 0, 0], sizes = [1, 2, 32], strides = [1, 1, 1]} : vector<3x2x32xf32> to vector<1x2x32xf32>
    %59 = vector.shape_cast %58 : vector<1x2x32xf32> to vector<2x32xf32>
    %60 = arith.addf %59, %47 : vector<2x32xf32>
    %61 = arith.negf %60 : vector<2x32xf32>
    %62 = math.exp %61 : vector<2x32xf32>
    %cst_25 = arith.constant 1.000000e+00 : f32
    %63 = vector.broadcast %cst_25 : f32 to vector<2x32xf32>
    %64 = arith.addf %63, %62 : vector<2x32xf32>
    %65 = arith.divf %63, %64 : vector<2x32xf32>
    %66 = vector.extract_strided_slice %45 {offsets = [2, 0, 0], sizes = [1, 2, 32], strides = [1, 1, 1]} : vector<3x2x32xf32> to vector<1x2x32xf32>
    %67 = vector.shape_cast %66 : vector<1x2x32xf32> to vector<2x32xf32>
    %68 = arith.mulf %57, %49 : vector<2x32xf32>
    %69 = arith.addf %67, %68 : vector<2x32xf32>
    %70 = math.tanh %69 : vector<2x32xf32>
    %cst_26 = arith.constant 1.000000e+00 : f32
    %71 = vector.broadcast %cst_26 : f32 to vector<2x32xf32>
    %72 = arith.subf %71, %65 : vector<2x32xf32>
    %73 = arith.mulf %72, %70 : vector<2x32xf32>
    %74 = arith.mulf %65, %42 : vector<2x32xf32>
    %75 = arith.addf %73, %74 : vector<2x32xf32>
    %c2_i32 = arith.constant 2 : i32
    %76 = arith.index_cast %c2_i32 : i32 to index
    %c0_27 = arith.constant 0 : index
    %c0_28 = arith.constant 0 : index
    %c0_29 = arith.constant 0 : index
    %77 = vector.load %arg0[%76, %c0_27, %c0_28, %c0_29] : memref<8x3x2x32xf32, #tpu.memory_space<vmem>>, vector<1x3x2x32xf32>
    %78 = vector.shape_cast %77 : vector<1x3x2x32xf32> to vector<3x2x32xf32>
    %cst_30 = arith.constant dense<0.000000e+00> : vector<2x32xf32>
    %79 = tpu.matmul %75, %1, %cst_30 {dimension_numbers = #tpu.dot_dimension_numbers<[1], [0], [0], [1], [0, 0, 1, 1], [], []>} : vector<2x32xf32>, vector<32x32xf32>, vector<2x32xf32> -> vector<2x32xf32>
    %cst_31 = arith.constant dense<0.000000e+00> : vector<2x32xf32>
    %80 = tpu.matmul %75, %3, %cst_31 {dimension_numbers = #tpu.dot_dimension_numbers<[1], [0], [0], [1], [0, 0, 1, 1], [], []>} : vector<2x32xf32>, vector<32x32xf32>, vector<2x32xf32> -> vector<2x32xf32>
    %cst_32 = arith.constant dense<0.000000e+00> : vector<2x32xf32>
    %81 = tpu.matmul %75, %5, %cst_32 {dimension_numbers = #tpu.dot_dimension_numbers<[1], [0], [0], [1], [0, 0, 1, 1], [], []>} : vector<2x32xf32>, vector<32x32xf32>, vector<2x32xf32> -> vector<2x32xf32>
    %82 = arith.addf %81, %8 : vector<2x32xf32>
    %83 = vector.extract_strided_slice %78 {offsets = [0, 0, 0], sizes = [1, 2, 32], strides = [1, 1, 1]} : vector<3x2x32xf32> to vector<1x2x32xf32>
    %84 = vector.shape_cast %83 : vector<1x2x32xf32> to vector<2x32xf32>
    %85 = arith.addf %84, %79 : vector<2x32xf32>
    %86 = arith.negf %85 : vector<2x32xf32>
    %87 = math.exp %86 : vector<2x32xf32>
    %cst_33 = arith.constant 1.000000e+00 : f32
    %88 = vector.broadcast %cst_33 : f32 to vector<2x32xf32>
    %89 = arith.addf %88, %87 : vector<2x32xf32>
    %90 = arith.divf %88, %89 : vector<2x32xf32>
    %91 = vector.extract_strided_slice %78 {offsets = [1, 0, 0], sizes = [1, 2, 32], strides = [1, 1, 1]} : vector<3x2x32xf32> to vector<1x2x32xf32>
    %92 = vector.shape_cast %91 : vector<1x2x32xf32> to vector<2x32xf32>
    %93 = arith.addf %92, %80 : vector<2x32xf32>
    %94 = arith.negf %93 : vector<2x32xf32>
    %95 = math.exp %94 : vector<2x32xf32>
    %cst_34 = arith.constant 1.000000e+00 : f32
    %96 = vector.broadcast %cst_34 : f32 to vector<2x32xf32>
    %97 = arith.addf %96, %95 : vector<2x32xf32>
    %98 = arith.divf %96, %97 : vector<2x32xf32>
    %99 = vector.extract_strided_slice %78 {offsets = [2, 0, 0], sizes = [1, 2, 32], strides = [1, 1, 1]} : vector<3x2x32xf32> to vector<1x2x32xf32>
    %100 = vector.shape_cast %99 : vector<1x2x32xf32> to vector<2x32xf32>
    %101 = arith.mulf %90, %82 : vector<2x32xf32>
    %102 = arith.addf %100, %101 : vector<2x32xf32>
    %103 = math.tanh %102 : vector<2x32xf32>
    %cst_35 = arith.constant 1.000000e+00 : f32
    %104 = vector.broadcast %cst_35 : f32 to vector<2x32xf32>
    %105 = arith.subf %104, %98 : vector<2x32xf32>
    %106 = arith.mulf %105, %103 : vector<2x32xf32>
    %107 = arith.mulf %98, %75 : vector<2x32xf32>
    %108 = arith.addf %106, %107 : vector<2x32xf32>
    %c3_i32 = arith.constant 3 : i32
    %109 = arith.index_cast %c3_i32 : i32 to index
    %c0_36 = arith.constant 0 : index
    %c0_37 = arith.constant 0 : index
    %c0_38 = arith.constant 0 : index
    %110 = vector.load %arg0[%109, %c0_36, %c0_37, %c0_38] : memref<8x3x2x32xf32, #tpu.memory_space<vmem>>, vector<1x3x2x32xf32>
    %111 = vector.shape_cast %110 : vector<1x3x2x32xf32> to vector<3x2x32xf32>
    %cst_39 = arith.constant dense<0.000000e+00> : vector<2x32xf32>
    %112 = tpu.matmul %108, %1, %cst_39 {dimension_numbers = #tpu.dot_dimension_numbers<[1], [0], [0], [1], [0, 0, 1, 1], [], []>} : vector<2x32xf32>, vector<32x32xf32>, vector<2x32xf32> -> vector<2x32xf32>
    %cst_40 = arith.constant dense<0.000000e+00> : vector<2x32xf32>
    %113 = tpu.matmul %108, %3, %cst_40 {dimension_numbers = #tpu.dot_dimension_numbers<[1], [0], [0], [1], [0, 0, 1, 1], [], []>} : vector<2x32xf32>, vector<32x32xf32>, vector<2x32xf32> -> vector<2x32xf32>
    %cst_41 = arith.constant dense<0.000000e+00> : vector<2x32xf32>
    %114 = tpu.matmul %108, %5, %cst_41 {dimension_numbers = #tpu.dot_dimension_numbers<[1], [0], [0], [1], [0, 0, 1, 1], [], []>} : vector<2x32xf32>, vector<32x32xf32>, vector<2x32xf32> -> vector<2x32xf32>
    %115 = arith.addf %114, %8 : vector<2x32xf32>
    %116 = vector.extract_strided_slice %111 {offsets = [0, 0, 0], sizes = [1, 2, 32], strides = [1, 1, 1]} : vector<3x2x32xf32> to vector<1x2x32xf32>
    %117 = vector.shape_cast %116 : vector<1x2x32xf32> to vector<2x32xf32>
    %118 = arith.addf %117, %112 : vector<2x32xf32>
    %119 = arith.negf %118 : vector<2x32xf32>
    %120 = math.exp %119 : vector<2x32xf32>
    %cst_42 = arith.constant 1.000000e+00 : f32
    %121 = vector.broadcast %cst_42 : f32 to vector<2x32xf32>
    %122 = arith.addf %121, %120 : vector<2x32xf32>
    %123 = arith.divf %121, %122 : vector<2x32xf32>
    %124 = vector.extract_strided_slice %111 {offsets = [1, 0, 0], sizes = [1, 2, 32], strides = [1, 1, 1]} : vector<3x2x32xf32> to vector<1x2x32xf32>
    %125 = vector.shape_cast %124 : vector<1x2x32xf32> to vector<2x32xf32>
    %126 = arith.addf %125, %113 : vector<2x32xf32>
    %127 = arith.negf %126 : vector<2x32xf32>
    %128 = math.exp %127 : vector<2x32xf32>
    %cst_43 = arith.constant 1.000000e+00 : f32
    %129 = vector.broadcast %cst_43 : f32 to vector<2x32xf32>
    %130 = arith.addf %129, %128 : vector<2x32xf32>
    %131 = arith.divf %129, %130 : vector<2x32xf32>
    %132 = vector.extract_strided_slice %111 {offsets = [2, 0, 0], sizes = [1, 2, 32], strides = [1, 1, 1]} : vector<3x2x32xf32> to vector<1x2x32xf32>
    %133 = vector.shape_cast %132 : vector<1x2x32xf32> to vector<2x32xf32>
    %134 = arith.mulf %123, %115 : vector<2x32xf32>
    %135 = arith.addf %133, %134 : vector<2x32xf32>
    %136 = math.tanh %135 : vector<2x32xf32>
    %cst_44 = arith.constant 1.000000e+00 : f32
    %137 = vector.broadcast %cst_44 : f32 to vector<2x32xf32>
    %138 = arith.subf %137, %131 : vector<2x32xf32>
    %139 = arith.mulf %138, %136 : vector<2x32xf32>
    %140 = arith.mulf %131, %108 : vector<2x32xf32>
    %141 = arith.addf %139, %140 : vector<2x32xf32>
    %c4_i32 = arith.constant 4 : i32
    %142 = arith.index_cast %c4_i32 : i32 to index
    %c0_45 = arith.constant 0 : index
    %c0_46 = arith.constant 0 : index
    %c0_47 = arith.constant 0 : index
    %143 = vector.load %arg0[%142, %c0_45, %c0_46, %c0_47] : memref<8x3x2x32xf32, #tpu.memory_space<vmem>>, vector<1x3x2x32xf32>
    %144 = vector.shape_cast %143 : vector<1x3x2x32xf32> to vector<3x2x32xf32>
    %cst_48 = arith.constant dense<0.000000e+00> : vector<2x32xf32>
    %145 = tpu.matmul %141, %1, %cst_48 {dimension_numbers = #tpu.dot_dimension_numbers<[1], [0], [0], [1], [0, 0, 1, 1], [], []>} : vector<2x32xf32>, vector<32x32xf32>, vector<2x32xf32> -> vector<2x32xf32>
    %cst_49 = arith.constant dense<0.000000e+00> : vector<2x32xf32>
    %146 = tpu.matmul %141, %3, %cst_49 {dimension_numbers = #tpu.dot_dimension_numbers<[1], [0], [0], [1], [0, 0, 1, 1], [], []>} : vector<2x32xf32>, vector<32x32xf32>, vector<2x32xf32> -> vector<2x32xf32>
    %cst_50 = arith.constant dense<0.000000e+00> : vector<2x32xf32>
    %147 = tpu.matmul %141, %5, %cst_50 {dimension_numbers = #tpu.dot_dimension_numbers<[1], [0], [0], [1], [0, 0, 1, 1], [], []>} : vector<2x32xf32>, vector<32x32xf32>, vector<2x32xf32> -> vector<2x32xf32>
    %148 = arith.addf %147, %8 : vector<2x32xf32>
    %149 = vector.extract_strided_slice %144 {offsets = [0, 0, 0], sizes = [1, 2, 32], strides = [1, 1, 1]} : vector<3x2x32xf32> to vector<1x2x32xf32>
    %150 = vector.shape_cast %149 : vector<1x2x32xf32> to vector<2x32xf32>
    %151 = arith.addf %150, %145 : vector<2x32xf32>
    %152 = arith.negf %151 : vector<2x32xf32>
    %153 = math.exp %152 : vector<2x32xf32>
    %cst_51 = arith.constant 1.000000e+00 : f32
    %154 = vector.broadcast %cst_51 : f32 to vector<2x32xf32>
    %155 = arith.addf %154, %153 : vector<2x32xf32>
    %156 = arith.divf %154, %155 : vector<2x32xf32>
    %157 = vector.extract_strided_slice %144 {offsets = [1, 0, 0], sizes = [1, 2, 32], strides = [1, 1, 1]} : vector<3x2x32xf32> to vector<1x2x32xf32>
    %158 = vector.shape_cast %157 : vector<1x2x32xf32> to vector<2x32xf32>
    %159 = arith.addf %158, %146 : vector<2x32xf32>
    %160 = arith.negf %159 : vector<2x32xf32>
    %161 = math.exp %160 : vector<2x32xf32>
    %cst_52 = arith.constant 1.000000e+00 : f32
    %162 = vector.broadcast %cst_52 : f32 to vector<2x32xf32>
    %163 = arith.addf %162, %161 : vector<2x32xf32>
    %164 = arith.divf %162, %163 : vector<2x32xf32>
    %165 = vector.extract_strided_slice %144 {offsets = [2, 0, 0], sizes = [1, 2, 32], strides = [1, 1, 1]} : vector<3x2x32xf32> to vector<1x2x32xf32>
    %166 = vector.shape_cast %165 : vector<1x2x32xf32> to vector<2x32xf32>
    %167 = arith.mulf %156, %148 : vector<2x32xf32>
    %168 = arith.addf %166, %167 : vector<2x32xf32>
    %169 = math.tanh %168 : vector<2x32xf32>
    %cst_53 = arith.constant 1.000000e+00 : f32
    %170 = vector.broadcast %cst_53 : f32 to vector<2x32xf32>
    %171 = arith.subf %170, %164 : vector<2x32xf32>
    %172 = arith.mulf %171, %169 : vector<2x32xf32>
    %173 = arith.mulf %164, %141 : vector<2x32xf32>
    %174 = arith.addf %172, %173 : vector<2x32xf32>
    %c5_i32 = arith.constant 5 : i32
    %175 = arith.index_cast %c5_i32 : i32 to index
    %c0_54 = arith.constant 0 : index
    %c0_55 = arith.constant 0 : index
    %c0_56 = arith.constant 0 : index
    %176 = vector.load %arg0[%175, %c0_54, %c0_55, %c0_56] : memref<8x3x2x32xf32, #tpu.memory_space<vmem>>, vector<1x3x2x32xf32>
    %177 = vector.shape_cast %176 : vector<1x3x2x32xf32> to vector<3x2x32xf32>
    %cst_57 = arith.constant dense<0.000000e+00> : vector<2x32xf32>
    %178 = tpu.matmul %174, %1, %cst_57 {dimension_numbers = #tpu.dot_dimension_numbers<[1], [0], [0], [1], [0, 0, 1, 1], [], []>} : vector<2x32xf32>, vector<32x32xf32>, vector<2x32xf32> -> vector<2x32xf32>
    %cst_58 = arith.constant dense<0.000000e+00> : vector<2x32xf32>
    %179 = tpu.matmul %174, %3, %cst_58 {dimension_numbers = #tpu.dot_dimension_numbers<[1], [0], [0], [1], [0, 0, 1, 1], [], []>} : vector<2x32xf32>, vector<32x32xf32>, vector<2x32xf32> -> vector<2x32xf32>
    %cst_59 = arith.constant dense<0.000000e+00> : vector<2x32xf32>
    %180 = tpu.matmul %174, %5, %cst_59 {dimension_numbers = #tpu.dot_dimension_numbers<[1], [0], [0], [1], [0, 0, 1, 1], [], []>} : vector<2x32xf32>, vector<32x32xf32>, vector<2x32xf32> -> vector<2x32xf32>
    %181 = arith.addf %180, %8 : vector<2x32xf32>
    %182 = vector.extract_strided_slice %177 {offsets = [0, 0, 0], sizes = [1, 2, 32], strides = [1, 1, 1]} : vector<3x2x32xf32> to vector<1x2x32xf32>
    %183 = vector.shape_cast %182 : vector<1x2x32xf32> to vector<2x32xf32>
    %184 = arith.addf %183, %178 : vector<2x32xf32>
    %185 = arith.negf %184 : vector<2x32xf32>
    %186 = math.exp %185 : vector<2x32xf32>
    %cst_60 = arith.constant 1.000000e+00 : f32
    %187 = vector.broadcast %cst_60 : f32 to vector<2x32xf32>
    %188 = arith.addf %187, %186 : vector<2x32xf32>
    %189 = arith.divf %187, %188 : vector<2x32xf32>
    %190 = vector.extract_strided_slice %177 {offsets = [1, 0, 0], sizes = [1, 2, 32], strides = [1, 1, 1]} : vector<3x2x32xf32> to vector<1x2x32xf32>
    %191 = vector.shape_cast %190 : vector<1x2x32xf32> to vector<2x32xf32>
    %192 = arith.addf %191, %179 : vector<2x32xf32>
    %193 = arith.negf %192 : vector<2x32xf32>
    %194 = math.exp %193 : vector<2x32xf32>
    %cst_61 = arith.constant 1.000000e+00 : f32
    %195 = vector.broadcast %cst_61 : f32 to vector<2x32xf32>
    %196 = arith.addf %195, %194 : vector<2x32xf32>
    %197 = arith.divf %195, %196 : vector<2x32xf32>
    %198 = vector.extract_strided_slice %177 {offsets = [2, 0, 0], sizes = [1, 2, 32], strides = [1, 1, 1]} : vector<3x2x32xf32> to vector<1x2x32xf32>
    %199 = vector.shape_cast %198 : vector<1x2x32xf32> to vector<2x32xf32>
    %200 = arith.mulf %189, %181 : vector<2x32xf32>
    %201 = arith.addf %199, %200 : vector<2x32xf32>
    %202 = math.tanh %201 : vector<2x32xf32>
    %cst_62 = arith.constant 1.000000e+00 : f32
    %203 = vector.broadcast %cst_62 : f32 to vector<2x32xf32>
    %204 = arith.subf %203, %197 : vector<2x32xf32>
    %205 = arith.mulf %204, %202 : vector<2x32xf32>
    %206 = arith.mulf %197, %174 : vector<2x32xf32>
    %207 = arith.addf %205, %206 : vector<2x32xf32>
    %c6_i32 = arith.constant 6 : i32
    %208 = arith.index_cast %c6_i32 : i32 to index
    %c0_63 = arith.constant 0 : index
    %c0_64 = arith.constant 0 : index
    %c0_65 = arith.constant 0 : index
    %209 = vector.load %arg0[%208, %c0_63, %c0_64, %c0_65] : memref<8x3x2x32xf32, #tpu.memory_space<vmem>>, vector<1x3x2x32xf32>
    %210 = vector.shape_cast %209 : vector<1x3x2x32xf32> to vector<3x2x32xf32>
    %cst_66 = arith.constant dense<0.000000e+00> : vector<2x32xf32>
    %211 = tpu.matmul %207, %1, %cst_66 {dimension_numbers = #tpu.dot_dimension_numbers<[1], [0], [0], [1], [0, 0, 1, 1], [], []>} : vector<2x32xf32>, vector<32x32xf32>, vector<2x32xf32> -> vector<2x32xf32>
    %cst_67 = arith.constant dense<0.000000e+00> : vector<2x32xf32>
    %212 = tpu.matmul %207, %3, %cst_67 {dimension_numbers = #tpu.dot_dimension_numbers<[1], [0], [0], [1], [0, 0, 1, 1], [], []>} : vector<2x32xf32>, vector<32x32xf32>, vector<2x32xf32> -> vector<2x32xf32>
    %cst_68 = arith.constant dense<0.000000e+00> : vector<2x32xf32>
    %213 = tpu.matmul %207, %5, %cst_68 {dimension_numbers = #tpu.dot_dimension_numbers<[1], [0], [0], [1], [0, 0, 1, 1], [], []>} : vector<2x32xf32>, vector<32x32xf32>, vector<2x32xf32> -> vector<2x32xf32>
    %214 = arith.addf %213, %8 : vector<2x32xf32>
    %215 = vector.extract_strided_slice %210 {offsets = [0, 0, 0], sizes = [1, 2, 32], strides = [1, 1, 1]} : vector<3x2x32xf32> to vector<1x2x32xf32>
    %216 = vector.shape_cast %215 : vector<1x2x32xf32> to vector<2x32xf32>
    %217 = arith.addf %216, %211 : vector<2x32xf32>
    %218 = arith.negf %217 : vector<2x32xf32>
    %219 = math.exp %218 : vector<2x32xf32>
    %cst_69 = arith.constant 1.000000e+00 : f32
    %220 = vector.broadcast %cst_69 : f32 to vector<2x32xf32>
    %221 = arith.addf %220, %219 : vector<2x32xf32>
    %222 = arith.divf %220, %221 : vector<2x32xf32>
    %223 = vector.extract_strided_slice %210 {offsets = [1, 0, 0], sizes = [1, 2, 32], strides = [1, 1, 1]} : vector<3x2x32xf32> to vector<1x2x32xf32>
    %224 = vector.shape_cast %223 : vector<1x2x32xf32> to vector<2x32xf32>
    %225 = arith.addf %224, %212 : vector<2x32xf32>
    %226 = arith.negf %225 : vector<2x32xf32>
    %227 = math.exp %226 : vector<2x32xf32>
    %cst_70 = arith.constant 1.000000e+00 : f32
    %228 = vector.broadcast %cst_70 : f32 to vector<2x32xf32>
    %229 = arith.addf %228, %227 : vector<2x32xf32>
    %230 = arith.divf %228, %229 : vector<2x32xf32>
    %231 = vector.extract_strided_slice %210 {offsets = [2, 0, 0], sizes = [1, 2, 32], strides = [1, 1, 1]} : vector<3x2x32xf32> to vector<1x2x32xf32>
    %232 = vector.shape_cast %231 : vector<1x2x32xf32> to vector<2x32xf32>
    %233 = arith.mulf %222, %214 : vector<2x32xf32>
    %234 = arith.addf %232, %233 : vector<2x32xf32>
    %235 = math.tanh %234 : vector<2x32xf32>
    %cst_71 = arith.constant 1.000000e+00 : f32
    %236 = vector.broadcast %cst_71 : f32 to vector<2x32xf32>
    %237 = arith.subf %236, %230 : vector<2x32xf32>
    %238 = arith.mulf %237, %235 : vector<2x32xf32>
    %239 = arith.mulf %230, %207 : vector<2x32xf32>
    %240 = arith.addf %238, %239 : vector<2x32xf32>
    %c7_i32 = arith.constant 7 : i32
    %241 = arith.index_cast %c7_i32 : i32 to index
    %c0_72 = arith.constant 0 : index
    %c0_73 = arith.constant 0 : index
    %c0_74 = arith.constant 0 : index
    %242 = vector.load %arg0[%241, %c0_72, %c0_73, %c0_74] : memref<8x3x2x32xf32, #tpu.memory_space<vmem>>, vector<1x3x2x32xf32>
    %243 = vector.shape_cast %242 : vector<1x3x2x32xf32> to vector<3x2x32xf32>
    %cst_75 = arith.constant dense<0.000000e+00> : vector<2x32xf32>
    %244 = tpu.matmul %240, %1, %cst_75 {dimension_numbers = #tpu.dot_dimension_numbers<[1], [0], [0], [1], [0, 0, 1, 1], [], []>} : vector<2x32xf32>, vector<32x32xf32>, vector<2x32xf32> -> vector<2x32xf32>
    %cst_76 = arith.constant dense<0.000000e+00> : vector<2x32xf32>
    %245 = tpu.matmul %240, %3, %cst_76 {dimension_numbers = #tpu.dot_dimension_numbers<[1], [0], [0], [1], [0, 0, 1, 1], [], []>} : vector<2x32xf32>, vector<32x32xf32>, vector<2x32xf32> -> vector<2x32xf32>
    %cst_77 = arith.constant dense<0.000000e+00> : vector<2x32xf32>
    %246 = tpu.matmul %240, %5, %cst_77 {dimension_numbers = #tpu.dot_dimension_numbers<[1], [0], [0], [1], [0, 0, 1, 1], [], []>} : vector<2x32xf32>, vector<32x32xf32>, vector<2x32xf32> -> vector<2x32xf32>
    %247 = arith.addf %246, %8 : vector<2x32xf32>
    %248 = vector.extract_strided_slice %243 {offsets = [0, 0, 0], sizes = [1, 2, 32], strides = [1, 1, 1]} : vector<3x2x32xf32> to vector<1x2x32xf32>
    %249 = vector.shape_cast %248 : vector<1x2x32xf32> to vector<2x32xf32>
    %250 = arith.addf %249, %244 : vector<2x32xf32>
    %251 = arith.negf %250 : vector<2x32xf32>
    %252 = math.exp %251 : vector<2x32xf32>
    %cst_78 = arith.constant 1.000000e+00 : f32
    %253 = vector.broadcast %cst_78 : f32 to vector<2x32xf32>
    %254 = arith.addf %253, %252 : vector<2x32xf32>
    %255 = arith.divf %253, %254 : vector<2x32xf32>
    %256 = vector.extract_strided_slice %243 {offsets = [1, 0, 0], sizes = [1, 2, 32], strides = [1, 1, 1]} : vector<3x2x32xf32> to vector<1x2x32xf32>
    %257 = vector.shape_cast %256 : vector<1x2x32xf32> to vector<2x32xf32>
    %258 = arith.addf %257, %245 : vector<2x32xf32>
    %259 = arith.negf %258 : vector<2x32xf32>
    %260 = math.exp %259 : vector<2x32xf32>
    %cst_79 = arith.constant 1.000000e+00 : f32
    %261 = vector.broadcast %cst_79 : f32 to vector<2x32xf32>
    %262 = arith.addf %261, %260 : vector<2x32xf32>
    %263 = arith.divf %261, %262 : vector<2x32xf32>
    %264 = vector.extract_strided_slice %243 {offsets = [2, 0, 0], sizes = [1, 2, 32], strides = [1, 1, 1]} : vector<3x2x32xf32> to vector<1x2x32xf32>
    %265 = vector.shape_cast %264 : vector<1x2x32xf32> to vector<2x32xf32>
    %266 = arith.mulf %255, %247 : vector<2x32xf32>
    %267 = arith.addf %265, %266 : vector<2x32xf32>
    %268 = math.tanh %267 : vector<2x32xf32>
    %cst_80 = arith.constant 1.000000e+00 : f32
    %269 = vector.broadcast %cst_80 : f32 to vector<2x32xf32>
    %270 = arith.subf %269, %263 : vector<2x32xf32>
    %271 = arith.mulf %270, %268 : vector<2x32xf32>
    %272 = arith.mulf %263, %240 : vector<2x32xf32>
    %273 = arith.addf %271, %272 : vector<2x32xf32>
    %c8_i32 = arith.constant 8 : i32
    %c0_81 = arith.constant 0 : index
    %c0_82 = arith.constant 0 : index
    %274 = vector.load %arg4[%c0_81, %c0_82] : memref<2x32xf32, #tpu.memory_space<vmem>>, vector<2x32xf32>
    tpu.vector_store %arg4[%c0_81, %c0_82], %273 {strides = array<i32>} : memref<2x32xf32, #tpu.memory_space<vmem>>, vector<2x32xf32>,
    return
  }
}

module attributes {stable_mosaic.version = 11 : i64} {
  func.func @_fc_kernel(%arg0: i32, %arg1: memref<2x32xf32, #tpu.memory_space<vmem>>, %arg2: memref<32x128xf32, #tpu.memory_space<vmem>>, %arg3: memref<1x128xf32, #tpu.memory_space<vmem>>, %arg4: memref<2x128xf32, #tpu.memory_space<vmem>>) attributes {dimension_semantics = [#tpu.dimension_semantics<parallel>], iteration_bounds = array<i64: 1>, scalar_prefetch = 0 : i64, scratch_operands = 0 : i64, tpu.core_type = #tpu.core_type<tc>, window_params = [{pipeline_mode = #tpu.pipeline_mode<synchronous>, transform_indices = @transform_0, window_bounds = array<i64: 2, 32>}, {transform_indices = @transform_1, window_bounds = array<i64: 32, 128>}, {transform_indices = @transform_2, window_bounds = array<i64: 1, 128>}, {transform_indices = @transform_3, window_bounds = array<i64: 2, 128>}]} {
    %c0 = arith.constant 0 : index
    %c0_0 = arith.constant 0 : index
    %0 = vector.load %arg1[%c0, %c0_0] : memref<2x32xf32, #tpu.memory_space<vmem>>, vector<2x32xf32>
    %c0_1 = arith.constant 0 : index
    %c0_2 = arith.constant 0 : index
    %1 = vector.load %arg2[%c0_1, %c0_2] : memref<32x128xf32, #tpu.memory_space<vmem>>, vector<32x128xf32>
    %cst = arith.constant dense<0.000000e+00> : vector<2x128xf32>
    %2 = tpu.matmul %0, %1, %cst {dimension_numbers = #tpu.dot_dimension_numbers<[1], [0], [0], [1], [0, 0, 1, 1], [], []>} : vector<2x32xf32>, vector<32x128xf32>, vector<2x128xf32> -> vector<2x128xf32>
    %c0_3 = arith.constant 0 : index
    %c0_4 = arith.constant 0 : index
    %3 = vector.load %arg3[%c0_3, %c0_4] : memref<1x128xf32, #tpu.memory_space<vmem>>, vector<1x128xf32>
    %4 = vector.broadcast %3 : vector<1x128xf32> to vector<2x128xf32>
    %5 = arith.addf %2, %4 : vector<2x128xf32>
    %c0_5 = arith.constant 0 : index
    %c0_6 = arith.constant 0 : index
    %6 = vector.load %arg4[%c0_5, %c0_6] : memref<2x128xf32, #tpu.memory_space<vmem>>, vector<2x128xf32>
    tpu.vector_store %arg4[%c0_5, %c0_6], %5 {strides = array<i32>} : memref<2x128xf32, #tpu.memory_space<vmem>>, vector<2x128xf32>,
    return
  }
  func.func @transform_0(%arg0: i32) -> (i32, i32) {
    %c0_i32 = arith.constant 0 : i32
    %c0_i32_0 = arith.constant 0 : i32
    %c0_i32_1 = arith.constant 0 : i32
    return %c0_i32, %c0_i32_0 : i32, i32
  }
  func.func @transform_1(%arg0: i32) -> (i32, i32) {
    %c0_i32 = arith.constant 0 : i32
    %c0_i32_0 = arith.constant 0 : i32
    return %c0_i32, %arg0 : i32, i32
  }
  func.func @transform_2(%arg0: i32) -> (i32, i32) {
    %c0_i32 = arith.constant 0 : i32
    %c0_i32_0 = arith.constant 0 : i32
    return %c0_i32, %arg0 : i32, i32
  }
  func.func @transform_3(%arg0: i32) -> (i32, i32) {
    %c0_i32 = arith.constant 0 : i32
    %c0_i32_0 = arith.constant 0 : i32
    return %c0_i32, %arg0 : i32, i32
  }
}

</mosaic_0001>

<bundles_post_ra>
// kernel: decoder_forward.3
= control target key start
LH: loop header
LB: loop body
LE: loop exit
PB: predicated region body
PF: predicated region fallthrough
CT: control target
= control target key end

     0   :  { %v168_v3 = vmov 0.0|0.0   ;;  %vm169_vm0 = vmmov 0   ;;  %v170_v6 = vmov 0.0   ;;  %s222_s0 = inlined_call_operand.vmem [shape: f32[2,32], index: 0, kind: input, shape index: {}]   ;;  %s223_s1 = inlined_call_operand.vmem [shape: f32[32,128], index: 1, kind: input, shape index: {}]   ;;  %s224_s2 = inlined_call_operand.vmem [shape: f32[1,128], index: 2, kind: input, shape index: {}]   ;;  %s225_s3 = inlined_call_operand.hbm [shape: f32[2,128], index: 3, kind: output, shape index: {}]  }
   0x1   :  { %v16_v0 = vld [vmem:[%s223_s1] sm:$0xff]  ;;  %v17_v1 = vld [vmem:[%s223_s1 + $0x8] sm:$0xff]  ;;  %v18_v2 = vld [vmem:[%s223_s1 + $0x10] sm:$0xff]  ;;  %134 = vmatprep.subr.bf16.mxu0 %v168_v3  ;;  %131 = vmatprep.mubr.msk.f32.mxu0 %vm169_vm0, %v170_v6 }
   0x2   :  { %v135_v4 = vpack.c.bf16 %v17_v1, %v16_v0  ;;  %v19_v5 = vld [vmem:[%s223_s1 + $0x18] sm:$0xff] }
   0x3   :  { %8 = vsyncpa [#allocation3], 0  ;;  %v138_v7 = vpack.c.bf16 %v19_v5, %v18_v2  ;;  %v15_v8 = vld [vmem:[%s222_s0] sm:$0x3]  ;;  %vm27_vm1 = vcmask 261120   ;;  %s171_s24 = smov [#allocation2]  }
   0x4   :  { %136 = vmatpush3.bf16.msra.mxu0 %v135_v4  ;;  %v116_v9 = vld [vmem:[%s224_s2] ss:$0 sm:$0xff]  ;;  %s108_s1 = sshll.u32 %s171_s24, 4  ;;  %s109_s1 = int_to_ptr.vmem [resolvable:$true] %s108_s1 }
   0x5   :  { %137 = vmatprep.subr.bf16.mxu0 %v168_v3  ;;  %s144_s25 = scalar_lea.vmem %s109_s1, 32  ;;  %p149_p1 = scmp.lt.s32.totalorder %s109_s1, %s109_s1 }
   0x6   :  { %p145_p0 = scmp.ne.s32.totalorder %s109_s1, %s144_s25  ;;  %p150_p2 = scmp.lt.s32.totalorder %s144_s25, %s144_s25 }
   0x8   :  { %139 = vmatpush3.bf16.msra.mxu0 %v138_v7  ;;  %p151_p3 = por %p150_p2, %p149_p1 }
   0xa   :  { %p152_p4 = pnand %p151_p3, %p145_p0 }
   0xb   :  { %132 = vmatmul.mubr.msk.f32.vlgmr.msra.gmra.mrb[0].mxu0 %vm27_vm1, %v15_v8 }
  0xde   :  { %v97_v10 = vpop.f32.mrb[0].mxu0 }
  0xdf   :  { %v98_v11 = vadd.f32 %v116_v9, %v97_v10  ;;  %v133_v12 = vpop.f32.mrb[1].mxu0 }
  0xe1   :  { %101 = vst [vmem:[#allocation2] sm:$0x3] %v98_v11 }
  0xe2   :  { %155 = shalt.err (!%p152_p4)
}
  0xe3   :  { %s156_s27 = scalar_lea.hbm %s225_s3, 32 }
  0xe4   :  { %p157_p5 = scmp.ne.s32.totalorder %s225_s3, %s156_s27  ;;  %p160_p6 = scmp.lt.u32.totalorder %s156_s27, %s225_s3 }
  0xe6   :  { %p162_p7 = pnand %p160_p6, %p157_p5 }
  0xe8   :  { %165 = shalt.err (!%p162_p7)
}
  0xe9   :  { %111 = dma.vmem_to_hbm [thread:$0]  %s109_s1, 32, %s225_s3, [#allocation3]  }
  0xea   :  { %166 = dma.done.wait [#allocation3], 32  }
  0xeb   :  { %167 = vsyncadd [#allocation3], 4294967264 }
  0xec   :  { %115 = vsyncpa [#allocation3], 1 }

// kernel: decoder_forward.2
= control target key start
LH: loop header
LB: loop body
LE: loop exit
PB: predicated region body
PF: predicated region fallthrough
CT: control target
= control target key end

     0   :  { %v2630_v0 = vmov 0.0|0.0   ;;  %vm2631_vm0 = vmmov 0   ;;  %v2632_v4 = vmov 0.0   ;;  %vm42_vm1 = vcmask 261120   ;;  %s2965_s2 = inlined_call_operand.vmem [shape: f32[3,32,32], index: 2, kind: input, shape index: {}]   ;;  %s2966_s1 = inlined_call_operand.vmem [shape: f32[2,32], index: 1, kind: input, shape index: {}]   ;;  %s2967_s0 = inlined_call_operand.vmem [shape: f32[8,3,2,32], index: 0, kind: input, shape index: {}]   ;;  %s2968_s3 = inlined_call_operand.vmem [shape: f32[1,32], index: 3, kind: input, shape index: {}]   ;;  %s2969_s4 = inlined_call_operand.vmem [shape: f32[2,32], index: 4, kind: output, shape index: {}]  }
   0x1   :  { %2403 = vmatprep.subr.bf16.mxu0 %v2630_v0  ;;  %v17_v1 = vld [vmem:[%s2965_s2] sm:$0xff]  ;;  %v18_v2 = vld [vmem:[%s2965_s2 + $0x8] sm:$0xff]  ;;  %v19_v3 = vld [vmem:[%s2965_s2 + $0x10] sm:$0xff]  ;;  %2147 = vmatprep.mubr.msk.f32.mxu0 %vm2631_vm0, %v2632_v4  ;;  %vm1943_vm2 = vcmask 254976  }
   0x2   :  { %v2670_v5 = vpack.c.bf16 %v18_v2, %v17_v1  ;;  %v20_v6 = vld [vmem:[%s2965_s2 + $0x18] sm:$0xff]  ;;  %2409 = vmatprep.subr.bf16.mxu1 %v2630_v0  ;;  %v1949_v7 = vld [vmem:[%s2965_s2 + $0x20] sm:$0xff]  ;;  %2158 = vmatprep.mubr.msk.f32.mxu1 %vm2631_vm0, %v2632_v4  ;;  %v1950_v8 = vld [vmem:[%s2965_s2 + $0x28] sm:$0xff] }
   0x3   :  { %v1951_v9 = vld [vmem:[%s2965_s2 + $0x30] sm:$0xff]  ;;  %v1952_v10 = vld [vmem:[%s2965_s2 + $0x38] sm:$0xff]  ;;  %v2691_v11 = vpack.c.bf16 %v20_v6, %v19_v3  ;;  %v2693_v12 = vpack.c.bf16 %v1950_v8, %v1949_v7  ;;  %v1953_v13 = vld [vmem:[%s2965_s2 + $0x40] sm:$0xff] }
   0x4   :  { %2405 = vmatpush3.bf16.msra.mxu0 %v2670_v5  ;;  %v1954_v14 = vld [vmem:[%s2965_s2 + $0x48] sm:$0xff]  ;;  %v2703_v15 = vpack.c.bf16 %v1952_v10, %v1951_v9  ;;  %v38_v16 = vld [vmem:[%s2966_s1] sm:$0x3]  ;;  %v1955_v18 = vld [vmem:[%s2965_s2 + $0x50] sm:$0xff] }
   0x5   :  { %2406 = vmatprep.subr.bf16.mxu0 %v2630_v0  ;;  %2411 = vmatpush3.bf16.msra.mxu1 %v2693_v12  ;;  %v2710_v17 = vpack.c.bf16 %v1954_v14, %v1953_v13  ;;  %v1956_v19 = vld [vmem:[%s2965_s2 + $0x58] sm:$0xff]  ;;  %v39_v21 = vld [vmem:[%s2967_s0] sm:$0x3]  ;;  %v40_v23 = vld [vmem:[%s2967_s0 + $0x2] sm:$0x3] }
   0x6   :  { %2412 = vmatprep.subr.bf16.mxu1 %v2630_v0  ;;  %v2723_v20 = vpack.c.bf16 %v1956_v19, %v1955_v18  ;;  %v2753_v36 = vld [vmem:[%s2968_s3] ss:$0 sm:$0xff]  ;;  %v41_v40 = vld [vmem:[%s2967_s0 + $0x4] sm:$0x3]  ;;  %v1963_v49 = vld [vmem:[%s2967_s0 + $0x6] sm:$0x3] }
   0x7   :  { %v1964_v53 = vld [vmem:[%s2967_s0 + $0x8] sm:$0x3]  ;;  %v1965_v6 = vld [vmem:[%s2967_s0 + $0xa] sm:$0x3]  ;;  %v1971_v19 = vld [vmem:[%s2967_s0 + $0xc] sm:$0x3] }
   0x8   :  { %2408 = vmatpush3.bf16.msra.mxu0 %v2691_v11 }
   0x9   :  { %2415 = vmatprep.subr.bf16.mxu0 %v2630_v0  ;;  %2414 = vmatpush3.bf16.msra.mxu1 %v2703_v15 }
   0xa   :  { %2421 = vmatprep.subr.bf16.mxu1 %v2630_v0 }
   0xb   :  { %2148 = vmatmul.mubr.msk.f32.vlgmr.msra.gmra.mrb[0].mxu0 %vm42_vm1, %v38_v16 }
   0xc   :  { %2417 = vmatpush3.bf16.msra.mxu0 %v2710_v17  ;;  %2169 = vmatprep.mubr.msk.f32.mxu0 %vm2631_vm0, %v2632_v4 }
   0xd   :  { %2159 = vmatmul.mubr.msk.f32.vlgmr.msra.gmra.mrb[0].mxu1 %vm42_vm1, %v38_v16  ;;  %2418 = vmatprep.subr.bf16.mxu0 %v2630_v0 }
   0xe   :  { %2423 = vmatpush3.bf16.msra.mxu1 %v2670_v5  ;;  %2180 = vmatprep.mubr.msk.f32.mxu1 %vm2631_vm0, %v2632_v4 }
   0xf   :  { %2424 = vmatprep.subr.bf16.mxu1 %v2630_v0 }
  0x10   :  { %2420 = vmatpush3.bf16.msra.mxu0 %v2723_v20 }
  0x11   :  { %2427 = vmatprep.subr.bf16.mxu0 %v2630_v0 }
  0x12   :  { %2426 = vmatpush3.bf16.msra.mxu1 %v2691_v11 }
  0x13   :  { %2170 = vmatmul.mubr.msk.f32.vlgmr.msra.gmra.mrb[2].mxu0 %vm42_vm1, %v38_v16  ;;  %2433 = vmatprep.subr.bf16.mxu1 %v2630_v0 }
  0x14   :  { %2429 = vmatpush3.bf16.msra.mxu0 %v2693_v12  ;;  %2191 = vmatprep.mubr.msk.f32.mxu0 %vm2631_vm0, %v2632_v4 }
  0x15   :  { %2430 = vmatprep.subr.bf16.mxu0 %v2630_v0 }
  0x18   :  { %2432 = vmatpush3.bf16.msra.mxu0 %v2703_v15 }
  0x19   :  { %2439 = vmatprep.subr.bf16.mxu0 %v2630_v0 }
  0xde   :  { %v112_v22 = vpop.f32.mrb[0].mxu0 }
  0xdf   :  { %v256_v24 = vadd.f32 %v112_v22, %v39_v21  ;;  %v2149_v25 = vpop.f32.mrb[1].mxu0 }
  0xe0   :  { %v182_v26 = vpop.f32.mrb[0].mxu1 }
  0xe1   :  { %v1961_v27 = vmul.f32 -1.442695, %v256_v24  ;;  %v263_v28 = vadd.f32 %v182_v26, %v40_v23  ;;  %v2160_v29 = vpop.f32.mrb[1].mxu1  ;;  %v1972_v24 = vld [vmem:[%s2967_s0 + $0xe] sm:$0x3] }
  0xe3   :  { %2550 = vpow2.f32 %v1961_v27  ;;  %v1962_v30 = vmul.f32 -1.442695, %v263_v28 }
  0xe5   :  { %2552 = vpow2.f32 %v1962_v30 }
  0xe6   :  { %v252_v31 = vpop.f32.mrb[2].mxu0 }
  0xe7   :  { %v2171_v32 = vpop.f32.mrb[3].mxu0  ;;  %v253_v38 = vadd.f32 %v2753_v36, %v252_v31 }
  0xed   :  { %v2551_v33 = vpop.eup %2550 }
  0xee   :  { %v260_v34 = vadd.f32 1.0, %v2551_v33 }
  0xef   :  { %v2553_v35 = vpop.eup %2552 }
  0xf0   :  { %2554 = vrcp.f32 %v260_v34  ;;  %v267_v37 = vadd.f32 1.0, %v2553_v35 }
  0xf2   :  { %2556 = vrcp.f32 %v267_v37 }
  0xfa   :  { %v2555_v39 = vpop.eup %2554 }
  0xfb   :  { %v270_v41 = vmul.f32 %v2555_v39, %v253_v38  ;;  %v1973_v39 = vld [vmem:[%s2967_s0 + $0x10] sm:$0x3] }
  0xfc   :  { %v2557_v43 = vpop.eup %2556 }
  0xfd   :  { %v271_v42 = vadd.f32 %v270_v41, %v41_v40  ;;  %v273_v44 = vsub.f32 1.0, %v2557_v43  ;;  %v275_v47 = vmul.f32 %v2557_v43, %v38_v16 }
  0xff   :  { %2558 = vtanh.f32 %v271_v42 }
 0x109   :  { %v2559_v45 = vpop.eup %2558 }
 0x10a   :  { %v274_v46 = vmul.f32 %v2559_v45, %v273_v44 }
 0x10c   :  { %v276_v48 = vadd.f32 %v275_v47, %v274_v46 }
 0x10e   :  { %2181 = vmatmul.mubr.msk.f32.vlgmr.msra.gmra.mrb[2].mxu1 %vm42_vm1, %v276_v48  ;;  %2192 = vmatmul.mubr.msk.f32.vlgmr.msra.gmra.mrb[4].mxu0 %vm42_vm1, %v276_v48 }
 0x10f   :  { %2435 = vmatpush3.bf16.msra.mxu1 %v2710_v17  ;;  %2202 = vmatprep.mubr.msk.f32.mxu1 %vm2631_vm0, %v2632_v4 }
 0x110   :  { %2436 = vmatprep.subr.bf16.mxu1 %v2630_v0  ;;  %2441 = vmatpush3.bf16.msra.mxu0 %v2670_v5 }
 0x111   :  { %2442 = vmatprep.subr.bf16.mxu0 %v2630_v0  ;;  %2213 = vmatprep.mubr.msk.f32.mxu0 %vm2631_vm0, %v2632_v4 }
 0x113   :  { %2438 = vmatpush3.bf16.msra.mxu1 %v2723_v20 }
 0x114   :  { %2445 = vmatprep.subr.bf16.mxu1 %v2630_v0  ;;  %2444 = vmatpush3.bf16.msra.mxu0 %v2691_v11 }
 0x115   :  { %2451 = vmatprep.subr.bf16.mxu0 %v2630_v0 }
 0x116   :  { %2203 = vmatmul.mubr.msk.f32.vlgmr.msra.gmra.mrb[4].mxu1 %vm42_vm1, %v276_v48 }
 0x117   :  { %2447 = vmatpush3.bf16.msra.mxu1 %v2693_v12  ;;  %2224 = vmatprep.mubr.msk.f32.mxu1 %vm2631_vm0, %v2632_v4 }
 0x118   :  { %2448 = vmatprep.subr.bf16.mxu1 %v2630_v0 }
 0x11b   :  { %2450 = vmatpush3.bf16.msra.mxu1 %v2703_v15 }
 0x11c   :  { %2457 = vmatprep.subr.bf16.mxu1 %v2630_v0 }
 0x1e1   :  { %v350_v50 = vpop.f32.mrb[2].mxu1  ;;  %v420_v51 = vpop.f32.mrb[4].mxu0 }
 0x1e2   :  { %v494_v52 = vadd.f32 %v1963_v49, %v350_v50  ;;  %v2182_v54 = vpop.f32.mrb[3].mxu1  ;;  %v2193_v55 = vpop.f32.mrb[5].mxu0  ;;  %v501_v57 = vadd.f32 %v1964_v53, %v420_v51 }
 0x1e4   :  { %v1969_v56 = vmul.f32 -1.442695, %v494_v52  ;;  %v1970_v58 = vmul.f32 -1.442695, %v501_v57  ;;  %v1980_v52 = vld [vmem:[%s2967_s0 + $0x14] sm:$0x3] }
 0x1e6   :  { %2560 = vpow2.f32 %v1969_v56 }
 0x1e7   :  { %2562 = vpow2.f32 %v1970_v58 }
 0x1e9   :  { %v490_v59 = vpop.f32.mrb[4].mxu1 }
 0x1ea   :  { %v2204_v60 = vpop.f32.mrb[5].mxu1  ;;  %v491_v2 = vadd.f32 %v2753_v36, %v490_v59 }
 0x1f0   :  { %v2561_v61 = vpop.eup %2560 }
 0x1f1   :  { %v498_v62 = vadd.f32 1.0, %v2561_v61  ;;  %v2563_v63 = vpop.eup %2562 }
 0x1f2   :  { %v505_v1 = vadd.f32 1.0, %v2563_v63 }
 0x1f3   :  { %2564 = vrcp.f32 %v498_v62 }
 0x1f4   :  { %2566 = vrcp.f32 %v505_v1 }
 0x1fd   :  { %v2565_v3 = vpop.eup %2564 }
 0x1fe   :  { %v508_v7 = vmul.f32 %v2565_v3, %v491_v2  ;;  %v2567_v9 = vpop.eup %2566  ;;  %v1981_v3 = vld [vmem:[%s2967_s0 + $0x16] sm:$0x3] }
 0x1ff   :  { %v511_v10 = vsub.f32 1.0, %v2567_v9  ;;  %v513_v16 = vmul.f32 %v2567_v9, %v276_v48  ;;  %v1979_v48 = vld [vmem:[%s2967_s0 + $0x12] sm:$0x3] }
 0x200   :  { %v509_v8 = vadd.f32 %v1965_v6, %v508_v7 }
 0x202   :  { %2568 = vtanh.f32 %v509_v8 }
 0x20c   :  { %v2569_v13 = vpop.eup %2568 }
 0x20d   :  { %v512_v14 = vmul.f32 %v2569_v13, %v511_v10 }
 0x20f   :  { %v514_v18 = vadd.f32 %v513_v16, %v512_v14 }
 0x211   :  { %2214 = vmatmul.mubr.msk.f32.vlgmr.msra.gmra.mrb[6].mxu0 %vm42_vm1, %v514_v18  ;;  %2225 = vmatmul.mubr.msk.f32.vlgmr.msra.gmra.mrb[6].mxu1 %vm42_vm1, %v514_v18 }
 0x212   :  { %2453 = vmatpush3.bf16.msra.mxu0 %v2710_v17  ;;  %2235 = vmatprep.mubr.msk.f32.mxu0 %vm2631_vm0, %v2632_v4 }
 0x213   :  { %2454 = vmatprep.subr.bf16.mxu0 %v2630_v0  ;;  %2459 = vmatpush3.bf16.msra.mxu1 %v2670_v5 }
 0x214   :  { %2460 = vmatprep.subr.bf16.mxu1 %v2630_v0  ;;  %2246 = vmatprep.mubr.msk.f32.mxu1 %vm2631_vm0, %v2632_v4 }
 0x216   :  { %2456 = vmatpush3.bf16.msra.mxu0 %v2723_v20 }
 0x217   :  { %2463 = vmatprep.subr.bf16.mxu0 %v2630_v0  ;;  %2462 = vmatpush3.bf16.msra.mxu1 %v2691_v11 }
 0x218   :  { %2469 = vmatprep.subr.bf16.mxu1 %v2630_v0 }
 0x219   :  { %2236 = vmatmul.mubr.msk.f32.vlgmr.msra.gmra.mrb[8].mxu0 %vm42_vm1, %v514_v18 }
 0x21a   :  { %2465 = vmatpush3.bf16.msra.mxu0 %v2693_v12  ;;  %2257 = vmatprep.mubr.msk.f32.mxu0 %vm2631_vm0, %v2632_v4 }
 0x21b   :  { %2466 = vmatprep.subr.bf16.mxu0 %v2630_v0 }
 0x21e   :  { %2468 = vmatpush3.bf16.msra.mxu0 %v2703_v15 }
 0x21f   :  { %2475 = vmatprep.subr.bf16.mxu0 %v2630_v0 }
 0x2e4   :  { %v588_v21 = vpop.f32.mrb[6].mxu0  ;;  %v658_v22 = vpop.f32.mrb[6].mxu1 }
 0x2e5   :  { %v732_v23 = vadd.f32 %v1971_v19, %v588_v21  ;;  %v2215_v25 = vpop.f32.mrb[7].mxu0  ;;  %v2226_v26 = vpop.f32.mrb[7].mxu1  ;;  %v739_v28 = vadd.f32 %v1972_v24, %v658_v22 }
 0x2e7   :  { %v1977_v27 = vmul.f32 -1.442695, %v732_v23  ;;  %v1978_v29 = vmul.f32 -1.442695, %v739_v28  ;;  %v1988_v23 = vld [vmem:[%s2967_s0 + $0x1a] sm:$0x3] }
 0x2e9   :  { %2570 = vpow2.f32 %v1977_v27 }
 0x2ea   :  { %2572 = vpow2.f32 %v1978_v29 }
 0x2ec   :  { %v728_v30 = vpop.f32.mrb[8].mxu0 }
 0x2ed   :  { %v2237_v31 = vpop.f32.mrb[9].mxu0  ;;  %v729_v37 = vadd.f32 %v2753_v36, %v728_v30 }
 0x2f3   :  { %v2571_v32 = vpop.eup %2570 }
 0x2f4   :  { %v736_v33 = vadd.f32 1.0, %v2571_v32  ;;  %v2573_v34 = vpop.eup %2572 }
 0x2f5   :  { %v743_v35 = vadd.f32 1.0, %v2573_v34 }
 0x2f6   :  { %2574 = vrcp.f32 %v736_v33 }
 0x2f7   :  { %2576 = vrcp.f32 %v743_v35 }
 0x300   :  { %v2575_v38 = vpop.eup %2574 }
 0x301   :  { %v746_v40 = vmul.f32 %v2575_v38, %v729_v37  ;;  %v2577_v42 = vpop.eup %2576  ;;  %v1989_v38 = vld [vmem:[%s2967_s0 + $0x1c] sm:$0x3] }
 0x302   :  { %v749_v43 = vsub.f32 1.0, %v2577_v42  ;;  %v751_v46 = vmul.f32 %v2577_v42, %v514_v18  ;;  %v1987_v18 = vld [vmem:[%s2967_s0 + $0x18] sm:$0x3] }
 0x303   :  { %v747_v41 = vadd.f32 %v1973_v39, %v746_v40 }
 0x305   :  { %2578 = vtanh.f32 %v747_v41 }
 0x30f   :  { %v2579_v44 = vpop.eup %2578 }
 0x310   :  { %v750_v45 = vmul.f32 %v2579_v44, %v749_v43 }
 0x312   :  { %v752_v47 = vadd.f32 %v751_v46, %v750_v45 }
 0x314   :  { %2247 = vmatmul.mubr.msk.f32.vlgmr.msra.gmra.mrb[8].mxu1 %vm42_vm1, %v752_v47  ;;  %2258 = vmatmul.mubr.msk.f32.vlgmr.msra.gmra.mrb[10].mxu0 %vm42_vm1, %v752_v47 }
 0x315   :  { %2471 = vmatpush3.bf16.msra.mxu1 %v2710_v17  ;;  %2268 = vmatprep.mubr.msk.f32.mxu1 %vm2631_vm0, %v2632_v4 }
 0x316   :  { %2472 = vmatprep.subr.bf16.mxu1 %v2630_v0  ;;  %2477 = vmatpush3.bf16.msra.mxu0 %v2670_v5 }
 0x317   :  { %2478 = vmatprep.subr.bf16.mxu0 %v2630_v0  ;;  %2279 = vmatprep.mubr.msk.f32.mxu0 %vm2631_vm0, %v2632_v4 }
 0x319   :  { %2474 = vmatpush3.bf16.msra.mxu1 %v2723_v20 }
 0x31a   :  { %2481 = vmatprep.subr.bf16.mxu1 %v2630_v0  ;;  %2480 = vmatpush3.bf16.msra.mxu0 %v2691_v11 }
 0x31b   :  { %2487 = vmatprep.subr.bf16.mxu0 %v2630_v0 }
 0x31c   :  { %2269 = vmatmul.mubr.msk.f32.vlgmr.msra.gmra.mrb[10].mxu1 %vm42_vm1, %v752_v47 }
 0x31d   :  { %2483 = vmatpush3.bf16.msra.mxu1 %v2693_v12  ;;  %2290 = vmatprep.mubr.msk.f32.mxu1 %vm2631_vm0, %v2632_v4 }
 0x31e   :  { %2484 = vmatprep.subr.bf16.mxu1 %v2630_v0 }
 0x321   :  { %2486 = vmatpush3.bf16.msra.mxu1 %v2703_v15 }
 0x322   :  { %2493 = vmatprep.subr.bf16.mxu1 %v2630_v0 }
 0x3e7   :  { %v826_v49 = vpop.f32.mrb[8].mxu1  ;;  %v896_v50 = vpop.f32.mrb[10].mxu0 }
 0x3e8   :  { %v970_v51 = vadd.f32 %v1979_v48, %v826_v49  ;;  %v2248_v53 = vpop.f32.mrb[9].mxu1  ;;  %v2259_v54 = vpop.f32.mrb[11].mxu0  ;;  %v977_v56 = vadd.f32 %v1980_v52, %v896_v50 }
 0x3ea   :  { %v1985_v55 = vmul.f32 -1.442695, %v970_v51  ;;  %v1986_v57 = vmul.f32 -1.442695, %v977_v56  ;;  %v1996_v51 = vld [vmem:[%s2967_s0 + $0x20] sm:$0x3] }
 0x3ec   :  { %2580 = vpow2.f32 %v1985_v55 }
 0x3ed   :  { %2582 = vpow2.f32 %v1986_v57 }
 0x3ef   :  { %v966_v58 = vpop.f32.mrb[10].mxu1 }
 0x3f0   :  { %v2270_v59 = vpop.f32.mrb[11].mxu1  ;;  %v967_v1 = vadd.f32 %v2753_v36, %v966_v58 }
 0x3f6   :  { %v2581_v60 = vpop.eup %2580 }
 0x3f7   :  { %v974_v61 = vadd.f32 1.0, %v2581_v60  ;;  %v2583_v62 = vpop.eup %2582 }
 0x3f8   :  { %v981_v63 = vadd.f32 1.0, %v2583_v62 }
 0x3f9   :  { %2584 = vrcp.f32 %v974_v61 }
 0x3fa   :  { %2586 = vrcp.f32 %v981_v63 }
 0x403   :  { %v2585_v2 = vpop.eup %2584 }
 0x404   :  { %v984_v6 = vmul.f32 %v2585_v2, %v967_v1  ;;  %v2587_v8 = vpop.eup %2586  ;;  %v1997_v2 = vld [vmem:[%s2967_s0 + $0x22] sm:$0x3] }
 0x405   :  { %v987_v9 = vsub.f32 1.0, %v2587_v8  ;;  %v989_v14 = vmul.f32 %v2587_v8, %v752_v47  ;;  %v1995_v47 = vld [vmem:[%s2967_s0 + $0x1e] sm:$0x3] }
 0x406   :  { %v985_v7 = vadd.f32 %v1981_v3, %v984_v6 }
 0x408   :  { %2588 = vtanh.f32 %v985_v7 }
 0x412   :  { %v2589_v10 = vpop.eup %2588 }
 0x413   :  { %v988_v13 = vmul.f32 %v2589_v10, %v987_v9 }
 0x415   :  { %v990_v16 = vadd.f32 %v989_v14, %v988_v13 }
 0x417   :  { %2280 = vmatmul.mubr.msk.f32.vlgmr.msra.gmra.mrb[12].mxu0 %vm42_vm1, %v990_v16  ;;  %2291 = vmatmul.mubr.msk.f32.vlgmr.msra.gmra.mrb[12].mxu1 %vm42_vm1, %v990_v16 }
 0x418   :  { %2489 = vmatpush3.bf16.msra.mxu0 %v2710_v17  ;;  %2301 = vmatprep.mubr.msk.f32.mxu0 %vm2631_vm0, %v2632_v4 }
 0x419   :  { %2490 = vmatprep.subr.bf16.mxu0 %v2630_v0  ;;  %2495 = vmatpush3.bf16.msra.mxu1 %v2670_v5 }
 0x41a   :  { %2496 = vmatprep.subr.bf16.mxu1 %v2630_v0  ;;  %2312 = vmatprep.mubr.msk.f32.mxu1 %vm2631_vm0, %v2632_v4 }
 0x41c   :  { %2492 = vmatpush3.bf16.msra.mxu0 %v2723_v20 }
 0x41d   :  { %2499 = vmatprep.subr.bf16.mxu0 %v2630_v0  ;;  %2498 = vmatpush3.bf16.msra.mxu1 %v2691_v11 }
 0x41e   :  { %2505 = vmatprep.subr.bf16.mxu1 %v2630_v0 }
 0x41f   :  { %2302 = vmatmul.mubr.msk.f32.vlgmr.msra.gmra.mrb[14].mxu0 %vm42_vm1, %v990_v16 }
 0x420   :  { %2501 = vmatpush3.bf16.msra.mxu0 %v2693_v12  ;;  %2323 = vmatprep.mubr.msk.f32.mxu0 %vm2631_vm0, %v2632_v4 }
 0x421   :  { %2502 = vmatprep.subr.bf16.mxu0 %v2630_v0 }
 0x424   :  { %2504 = vmatpush3.bf16.msra.mxu0 %v2703_v15 }
 0x425   :  { %2511 = vmatprep.subr.bf16.mxu0 %v2630_v0 }
 0x4ea   :  { %v1064_v19 = vpop.f32.mrb[12].mxu0  ;;  %v1134_v21 = vpop.f32.mrb[12].mxu1 }
 0x4eb   :  { %v1208_v22 = vadd.f32 %v1987_v18, %v1064_v19  ;;  %v2281_v24 = vpop.f32.mrb[13].mxu0  ;;  %v2292_v25 = vpop.f32.mrb[13].mxu1  ;;  %v1215_v27 = vadd.f32 %v1988_v23, %v1134_v21  ;;  %v2004_v19 = vld [vmem:[%s2967_s0 + $0x26] sm:$0x3] }
 0x4ed   :  { %v1993_v26 = vmul.f32 -1.442695, %v1208_v22  ;;  %v1994_v28 = vmul.f32 -1.442695, %v1215_v27 }
 0x4ef   :  { %2590 = vpow2.f32 %v1993_v26 }
 0x4f0   :  { %2592 = vpow2.f32 %v1994_v28 }
 0x4f2   :  { %v1204_v29 = vpop.f32.mrb[14].mxu0 }
 0x4f3   :  { %v2303_v30 = vpop.f32.mrb[15].mxu0  ;;  %v1205_v35 = vadd.f32 %v2753_v36, %v1204_v29 }
 0x4f9   :  { %v2591_v31 = vpop.eup %2590 }
 0x4fa   :  { %v1212_v32 = vadd.f32 1.0, %v2591_v31  ;;  %v2593_v33 = vpop.eup %2592 }
 0x4fb   :  { %v1219_v34 = vadd.f32 1.0, %v2593_v33 }
 0x4fc   :  { %2594 = vrcp.f32 %v1212_v32  ;;  %v2005_v32 = vld [vmem:[%s2967_s0 + $0x28] sm:$0x3] }
 0x4fd   :  { %2596 = vrcp.f32 %v1219_v34 }
 0x506   :  { %v2595_v37 = vpop.eup %2594 }
 0x507   :  { %v1222_v39 = vmul.f32 %v2595_v37, %v1205_v35  ;;  %v2597_v41 = vpop.eup %2596 }
 0x508   :  { %v1225_v42 = vsub.f32 1.0, %v2597_v41  ;;  %v1227_v45 = vmul.f32 %v2597_v41, %v990_v16 }
 0x509   :  { %v1223_v40 = vadd.f32 %v1989_v38, %v1222_v39 }
 0x50b   :  { %2598 = vtanh.f32 %v1223_v40 }
 0x515   :  { %v2599_v43 = vpop.eup %2598 }
 0x516   :  { %v1226_v44 = vmul.f32 %v2599_v43, %v1225_v42  ;;  %v2011_v42 = vld [vmem:[%s2967_s0 + $0x2a] sm:$0x3] }
 0x518   :  { %v1228_v46 = vadd.f32 %v1227_v45, %v1226_v44 }
 0x51a   :  { %2313 = vmatmul.mubr.msk.f32.vlgmr.msra.gmra.mrb[14].mxu1 %vm42_vm1, %v1228_v46  ;;  %2324 = vmatmul.mubr.msk.f32.vlgmr.msra.gmra.mrb[16].mxu0 %vm42_vm1, %v1228_v46 }
 0x51b   :  { %2507 = vmatpush3.bf16.msra.mxu1 %v2710_v17  ;;  %2334 = vmatprep.mubr.msk.f32.mxu1 %vm2631_vm0, %v2632_v4 }
 0x51c   :  { %2508 = vmatprep.subr.bf16.mxu1 %v2630_v0  ;;  %2513 = vmatpush3.bf16.msra.mxu0 %v2670_v5 }
 0x51d   :  { %2514 = vmatprep.subr.bf16.mxu0 %v2630_v0  ;;  %2345 = vmatprep.mubr.msk.f32.mxu0 %vm2631_vm0, %v2632_v4 }
 0x51f   :  { %2510 = vmatpush3.bf16.msra.mxu1 %v2723_v20 }
 0x520   :  { %2517 = vmatprep.subr.bf16.mxu1 %v2630_v0  ;;  %2516 = vmatpush3.bf16.msra.mxu0 %v2691_v11 }
 0x521   :  { %2523 = vmatprep.subr.bf16.mxu0 %v2630_v0 }
 0x522   :  { %2335 = vmatmul.mubr.msk.f32.vlgmr.msra.gmra.mrb[16].mxu1 %vm42_vm1, %v1228_v46 }
 0x523   :  { %2519 = vmatpush3.bf16.msra.mxu1 %v2693_v12  ;;  %2356 = vmatprep.mubr.msk.f32.mxu1 %vm2631_vm0, %v2632_v4 }
 0x524   :  { %2520 = vmatprep.subr.bf16.mxu1 %v2630_v0 }
 0x527   :  { %2522 = vmatpush3.bf16.msra.mxu1 %v2703_v15 }
 0x528   :  { %2529 = vmatprep.subr.bf16.mxu1 %v2630_v0 }
 0x5ed   :  { %v1302_v48 = vpop.f32.mrb[14].mxu1  ;;  %v1372_v49 = vpop.f32.mrb[16].mxu0 }
 0x5ee   :  { %v1446_v50 = vadd.f32 %v1995_v47, %v1302_v48  ;;  %v2314_v52 = vpop.f32.mrb[15].mxu1  ;;  %v2325_v53 = vpop.f32.mrb[17].mxu0  ;;  %v1453_v55 = vadd.f32 %v1996_v51, %v1372_v49 }
 0x5f0   :  { %v2001_v54 = vmul.f32 -1.442695, %v1446_v50  ;;  %v2002_v56 = vmul.f32 -1.442695, %v1453_v55 }
 0x5f2   :  { %2600 = vpow2.f32 %v2001_v54 }
 0x5f3   :  { %2602 = vpow2.f32 %v2002_v56  ;;  %v2013_v56 = vld [vmem:[%s2967_s0 + $0x2e] sm:$0x3] }
 0x5f5   :  { %v1442_v57 = vpop.f32.mrb[16].mxu1 }
 0x5f6   :  { %v2336_v58 = vpop.f32.mrb[17].mxu1  ;;  %v1443_v63 = vadd.f32 %v2753_v36, %v1442_v57 }
 0x5fc   :  { %v2601_v59 = vpop.eup %2600 }
 0x5fd   :  { %v1450_v60 = vadd.f32 1.0, %v2601_v59  ;;  %v2603_v61 = vpop.eup %2602 }
 0x5fe   :  { %v1457_v62 = vadd.f32 1.0, %v2603_v61 }
 0x5ff   :  { %2604 = vrcp.f32 %v1450_v60 }
 0x600   :  { %2606 = vrcp.f32 %v1457_v62 }
 0x609   :  { %v2605_v1 = vpop.eup %2604 }
 0x60a   :  { %v1460_v3 = vmul.f32 %v2605_v1, %v1443_v63  ;;  %v2607_v7 = vpop.eup %2606 }
 0x60b   :  { %v1463_v8 = vsub.f32 1.0, %v2607_v7  ;;  %v1465_v13 = vmul.f32 %v2607_v7, %v1228_v46 }
 0x60c   :  { %v1461_v6 = vadd.f32 %v1997_v2, %v1460_v3 }
 0x60e   :  { %2608 = vtanh.f32 %v1461_v6 }
 0x618   :  { %v2609_v9 = vpop.eup %2608 }
 0x619   :  { %v1464_v10 = vmul.f32 %v2609_v9, %v1463_v8 }
 0x61b   :  { %v1466_v14 = vadd.f32 %v1465_v13, %v1464_v10 }
 0x61d   :  { %2346 = vmatmul.mubr.msk.f32.vlgmr.msra.gmra.mrb[18].mxu0 %vm42_vm1, %v1466_v14  ;;  %2357 = vmatmul.mubr.msk.f32.vlgmr.msra.gmra.mrb[18].mxu1 %vm42_vm1, %v1466_v14 }
 0x61e   :  { %2525 = vmatpush3.bf16.msra.mxu0 %v2710_v17  ;;  %2367 = vmatprep.mubr.msk.f32.mxu0 %vm2631_vm0, %v2632_v4 }
 0x61f   :  { %2526 = vmatprep.subr.bf16.mxu0 %v2630_v0  ;;  %2531 = vmatpush3.bf16.msra.mxu1 %v2670_v5  ;;  %v2003_v5 = vld [vmem:[%s2967_s0 + $0x24] sm:$0x3] }
 0x620   :  { %2532 = vmatprep.subr.bf16.mxu1 %v2630_v0  ;;  %2378 = vmatprep.mubr.msk.f32.mxu1 %vm2631_vm0, %v2632_v4 }
 0x622   :  { %2528 = vmatpush3.bf16.msra.mxu0 %v2723_v20 }
 0x623   :  { %2535 = vmatprep.subr.bf16.mxu0 %v2630_v0  ;;  %2534 = vmatpush3.bf16.msra.mxu1 %v2691_v11 }
 0x624   :  { %2541 = vmatprep.subr.bf16.mxu1 %v2630_v0 }
 0x625   :  { %2368 = vmatmul.mubr.msk.f32.vlgmr.msra.gmra.mrb[20].mxu0 %vm42_vm1, %v1466_v14 }
 0x626   :  { %2537 = vmatpush3.bf16.msra.mxu0 %v2693_v12  ;;  %2389 = vmatprep.mubr.msk.f32.mxu0 %vm2631_vm0, %v2632_v4 }
 0x627   :  { %2538 = vmatprep.subr.bf16.mxu0 %v2630_v0 }
 0x62a   :  { %2540 = vmatpush3.bf16.msra.mxu0 %v2703_v15 }
 0x6f0   :  { %v1540_v16 = vpop.f32.mrb[18].mxu0  ;;  %v1610_v18 = vpop.f32.mrb[18].mxu1 }
 0x6f1   :  { %v1684_v11 = vadd.f32 %v2003_v5, %v1540_v16  ;;  %v2347_v21 = vpop.f32.mrb[19].mxu0  ;;  %v2358_v12 = vpop.f32.mrb[19].mxu1  ;;  %v1691_v23 = vadd.f32 %v2004_v19, %v1610_v18 }
 0x6f3   :  { %v2009_v22 = vmul.f32 -1.442695, %v1684_v11  ;;  %v2010_v24 = vmul.f32 -1.442695, %v1691_v23 }
 0x6f5   :  { %2610 = vpow2.f32 %v2009_v22 }
 0x6f6   :  { %2612 = vpow2.f32 %v2010_v24 }
 0x6f8   :  { %v1680_v25 = vpop.f32.mrb[20].mxu0 }
 0x6f9   :  { %v2369_v26 = vpop.f32.mrb[21].mxu0  ;;  %v1681_v30 = vadd.f32 %v2753_v36, %v1680_v25 }
 0x6ff   :  { %v2611_v15 = vpop.eup %2610 }
 0x700   :  { %v1688_v27 = vadd.f32 1.0, %v2611_v15  ;;  %v2613_v28 = vpop.eup %2612 }
 0x701   :  { %v1695_v29 = vadd.f32 1.0, %v2613_v28 }
 0x702   :  { %2614 = vrcp.f32 %v1688_v27 }
 0x703   :  { %2616 = vrcp.f32 %v1695_v29 }
 0x70c   :  { %v2615_v31 = vpop.eup %2614 }
 0x70d   :  { %v1698_v33 = vmul.f32 %v2615_v31, %v1681_v30  ;;  %v2617_v35 = vpop.eup %2616 }
 0x70e   :  { %v1701_v37 = vsub.f32 1.0, %v2617_v35  ;;  %v1703_v40 = vmul.f32 %v2617_v35, %v1466_v14 }
 0x70f   :  { %v1699_v34 = vadd.f32 %v2005_v32, %v1698_v33 }
 0x711   :  { %2618 = vtanh.f32 %v1699_v34 }
 0x71b   :  { %v2619_v38 = vpop.eup %2618 }
 0x71c   :  { %v1702_v39 = vmul.f32 %v2619_v38, %v1701_v37 }
 0x71e   :  { %v1704_v41 = vadd.f32 %v1703_v40, %v1702_v39 }
 0x720   :  { %2379 = vmatmul.mubr.msk.f32.vlgmr.msra.gmra.mrb[20].mxu1 %vm42_vm1, %v1704_v41  ;;  %2390 = vmatmul.mubr.msk.f32.vlgmr.msra.gmra.mrb[22].mxu0 %vm42_vm1, %v1704_v41 }
 0x721   :  { %2543 = vmatpush3.bf16.msra.mxu1 %v2710_v17  ;;  %2400 = vmatprep.mubr.msk.f32.mxu1 %vm2631_vm0, %v2632_v4  ;;  %v2012_v17 = vld [vmem:[%s2967_s0 + $0x2c] sm:$0x3] }
 0x722   :  { %2544 = vmatprep.subr.bf16.mxu1 %v2630_v0 }
 0x725   :  { %2546 = vmatpush3.bf16.msra.mxu1 %v2723_v20 }
 0x728   :  { %2401 = vmatmul.mubr.msk.f32.vlgmr.msra.gmra.mrb[22].mxu1 %vm42_vm1, %v1704_v41 }
 0x7f3   :  { %v1778_v43 = vpop.f32.mrb[20].mxu1  ;;  %v1848_v44 = vpop.f32.mrb[22].mxu0 }
 0x7f4   :  { %v1922_v45 = vadd.f32 %v2011_v42, %v1778_v43  ;;  %v2380_v46 = vpop.f32.mrb[21].mxu1  ;;  %v2391_v47 = vpop.f32.mrb[23].mxu0  ;;  %v1929_v48 = vadd.f32 %v2012_v17, %v1848_v44 }
 0x7f6   :  { %v2017_v4 = vmul.f32 -1.442695, %v1922_v45  ;;  %v2018_v0 = vmul.f32 -1.442695, %v1929_v48 }
 0x7f8   :  { %2620 = vpow2.f32 %v2017_v4 }
 0x7f9   :  { %2622 = vpow2.f32 %v2018_v0 }
 0x7fb   :  { %v1918_v20 = vpop.f32.mrb[22].mxu1 }
 0x7fc   :  { %v2402_v49 = vpop.f32.mrb[23].mxu1  ;;  %v1919_v54 = vadd.f32 %v2753_v36, %v1918_v20 }
 0x802   :  { %v2621_v50 = vpop.eup %2620 }
 0x803   :  { %v1926_v51 = vadd.f32 1.0, %v2621_v50  ;;  %v2623_v52 = vpop.eup %2622 }
 0x804   :  { %v1933_v53 = vadd.f32 1.0, %v2623_v52 }
 0x805   :  { %2624 = vrcp.f32 %v1926_v51 }
 0x806   :  { %2626 = vrcp.f32 %v1933_v53 }
 0x80f   :  { %v2625_v55 = vpop.eup %2624 }
 0x810   :  { %v1936_v57 = vmul.f32 %v2625_v55, %v1919_v54  ;;  %v2627_v59 = vpop.eup %2626 }
 0x811   :  { %v1939_v60 = vsub.f32 1.0, %v2627_v59  ;;  %v1941_v62 = vmul.f32 %v2627_v59, %v1704_v41 }
 0x812   :  { %v1937_v58 = vadd.f32 %v2013_v56, %v1936_v57 }
 0x814   :  { %2628 = vtanh.f32 %v1937_v58 }
 0x81e   :  { %v2629_v61 = vpop.eup %2628 }
 0x81f   :  { %v1940_v63 = vmul.f32 %v2629_v61, %v1939_v60 }
 0x821   :  { %v1942_v1 = vadd.f32 %v1941_v62, %v1940_v63 }
 0x823   :  { %1944 = vst.msk [vmem:[%s2969_s4] sm:$0x3] %vm1943_vm2, %v1942_v1 }

</bundles_post_ra>
